<compile_context>
chip_gen: v7x
topology: tpu7x:2x2x1
jax: 0.10.0
libtpu: 0.0.40
codegen_flags: <defaults>
</compile_context>

<pallas_src>
import functools
import math

import jax
import jax.numpy as jnp
from jax.experimental import pallas as pl
from jax.experimental.pallas import tpu as pltpu


def _round_up(x: int, m: int) -> int:
    return (x + m - 1) // m * m


# ---------------------------------------------------------------------------
# Kernel 1: Y = X @ Theta + b   (row-tiled; emits the bf16 MXU / residual copy)
# ---------------------------------------------------------------------------
def theta_kernel(x_ref, w_ref, b_ref, y_ref):
    y = jnp.dot(x_ref[...], w_ref[...], preferred_element_type=jnp.float32)
    y_ref[...] = (y + b_ref[...]).astype(y_ref.dtype)


# ---------------------------------------------------------------------------
# Kernel 2: out = relu(L @ Y + Y)
#   L streamed in (tm, tk) tiles over grid (i, k); Y fully VMEM-resident
#   (constant index_map) and sliced in-kernel; the f32 output block itself is
#   the accumulator (k-invariant block index -> resident across the reduction).
# ---------------------------------------------------------------------------
def smooth_kernel(l_ref, y_ref, o_ref, *, tm, tk, apply_act):
    i = pl.program_id(0)
    k = pl.program_id(1)

    @pl.when(k == 0)
    def _():
        # Seed with the jump (residual) rows of Y, upcast to f32.
        r0 = pl.multiple_of(i * tm, tm)
        o_ref[...] = y_ref[pl.ds(r0, tm), :].astype(jnp.float32)

    c0 = pl.multiple_of(k * tk, tk)
    o_ref[...] += jnp.dot(l_ref[...], y_ref[pl.ds(c0, tk), :],
                          preferred_element_type=jnp.float32)

    @pl.when(k == pl.num_programs(1) - 1)
    def _():
        if apply_act:
            o_ref[...] = jnp.maximum(o_ref[...], 0.0)


# ---------------------------------------------------------------------------
# Builder: pads / casts the static operands ONCE and returns a jitted forward.
# ---------------------------------------------------------------------------
def make_jhconv(theta_t, bias, L, *, tm=None, tk=None, use_bf16=True,
                apply_act=True):
    """theta_t: (Cin, Cout) f32, bias: (1, Cout) f32, L: (N, N) f32."""
    N = L.shape[0]
    Cin, Cout = theta_t.shape
    Cout_p = _round_up(Cout, 128)                 # lane-dense output columns

    # ---- tile selection ----------------------------------------------------
    if tm is None:
        tm = min(1024, _round_up(N, 128))
        if N >= 256:                              # >= 2 row tiles for v7x megacore
            tm = min(tm, _round_up(-(-N // 2), 128))
    if tk is None:
        tk = min(1024, _round_up(N, 128))
    assert tm % 128 == 0 and tk % 128 == 0, "tiles must be multiples of 128"

    # Independent row/col padding (no lcm blowup).
    N_row_p = _round_up(N, tm)                    # rows of L / output
    N_col_p = _round_up(N, tk)                    # cols of L (reduction extent)
    N_y_p = _round_up(max(N_row_p, N_col_p), tm)  # rows of X / Y (covers both uses)

    mm_dtype = jnp.bfloat16 if use_bf16 else jnp.float32
    mm_bytes = 2 if use_bf16 else 4

    # ---- one-time padding / casting (hoisted out of the per-call path) ------
    w_p = jnp.zeros((Cin, Cout_p), jnp.float32).at[:, :Cout].set(theta_t)
    b_p = jnp.zeros((1, Cout_p), jnp.float32).at[:, :Cout].set(
        jnp.asarray(bias, jnp.float32).reshape(1, Cout))
    L_p = jnp.zeros((N_row_p, N_col_p), mm_dtype).at[:N, :N].set(
        L.astype(mm_dtype))

    # ---- VMEM budget (v7x-safe: 64 MiB physical) ----------------------------
    resident_y = N_y_p * Cout_p * mm_bytes
    footprint = (2 * resident_y                     # resident Y (conservative x2;
                                                    # pl.Buffered(1) would halve it)
                 + 2 * tm * tk * mm_bytes           # L tile double buffer
                 + 2 * tm * Cout_p * 4              # output block double buffer
                 + 2 * tm * Cin * 4                 # kernel-1 X tiles
                 + Cin * Cout_p * 4 + Cout_p * 4)   # weights + bias
    if footprint > 56 * 2**20:
        raise NotImplementedError(
            "resident-Y footprint exceeds the v7x VMEM budget; "
            "use the fused / factored variant (see TODOs).")
    vmem_limit = min(56 * 2**20, max(32 * 2**20, int(footprint * 1.25)))

    # ---- kernel 1: Y = X @ Theta + b ----------------------------------------
    k1 = pl.pallas_call(
        theta_kernel,
        out_shape=jax.ShapeDtypeStruct((N_y_p, Cout_p), mm_dtype),
        grid=(N_y_p // tm,),
        in_specs=[
            pl.BlockSpec((tm, Cin), lambda i: (i, 0)),
            pl.BlockSpec((Cin, Cout_p), lambda i: (0, 0)),
            pl.BlockSpec((1, Cout_p), lambda i: (0, 0)),
        ],
        out_specs=pl.BlockSpec((tm, Cout_p), lambda i: (i, 0)),
        compiler_params=pltpu.CompilerParams(
            dimension_semantics=("parallel",),
            vmem_limit_bytes=vmem_limit),
        cost_estimate=pl.CostEstimate(
            flops=2 * N_y_p * Cin * Cout_p,
            transcendentals=0,
            bytes_accessed=N_y_p * Cin * 4 + Cin * Cout_p * 4
                           + N_y_p * Cout_p * mm_bytes),
    )

    # ---- kernel 2: out = relu(L @ Y + Y) ------------------------------------
    k2 = pl.pallas_call(
        functools.partial(smooth_kernel, tm=tm, tk=tk, apply_act=apply_act),
        out_shape=jax.ShapeDtypeStruct((N_row_p, Cout_p), jnp.float32),
        grid=(N_row_p // tm, N_col_p // tk),
        in_specs=[
            pl.BlockSpec((tm, tk), lambda i, k: (i, k)),         # L tile (streamed)
            pl.BlockSpec((N_y_p, Cout_p), lambda i, k: (0, 0)),  # Y (VMEM-resident)
        ],
        out_specs=pl.BlockSpec((tm, Cout_p), lambda i, k: (i, 0)),
        compiler_params=pltpu.CompilerParams(
            dimension_semantics=("parallel", "arbitrary"),
            vmem_limit_bytes=vmem_limit),
        cost_estimate=pl.CostEstimate(
            flops=2 * N_row_p * N_col_p * Cout_p,
            transcendentals=0,
            bytes_accessed=N_row_p * N_col_p * mm_bytes
                           + N_y_p * Cout_p * mm_bytes
                           + N_row_p * Cout_p * 4),
    )

    @jax.jit
    def forward(x):
        # Per-call host-side work is only the X pad; L/Theta/bias were prepared once.
        x_p = jnp.zeros((N_y_p, Cin), jnp.float32).at[:N, :].set(x)
        y_mm = k1(x_p, w_p, b_p)
        out_p = k2(L_p, y_mm)
        return out_p[:N, :Cout]

    return forward


# ---------------------------------------------------------------------------
# Hypergraph glue: L = D_v^{-1/2} H W_e D_e^{-1} H^T D_v^{-1/2}  (dhg semantics)
# ---------------------------------------------------------------------------
def build_hgnn_laplacian(H, w_e):
    d_v = H @ w_e
    d_e = H.sum(axis=0)
    dv_inv_sqrt = jnp.where(d_v > 0, 1.0 / jnp.sqrt(d_v), 0.0)
    de_inv = jnp.where(d_e > 0, 1.0 / d_e, 0.0)
    left = dv_inv_sqrt[:, None] * H * (w_e * de_inv)[None, :]
    right = H.T * dv_inv_sqrt[None, :]
    return left @ right


if __name__ == "__main__":
    key = jax.random.PRNGKey(0)
    k_x, k_h, k_w, k_b = jax.random.split(key, 4)

    N, M = 300, 128          # vertices, hyperedges (N not a tile multiple on purpose)
    C_in, C_out = 32, 64     # Cout < 128 exercises the lane-padding path

    X = jax.random.normal(k_x, (N, C_in), dtype=jnp.float32)
    H = (jax.random.uniform(k_h, (N, M)) < 0.25).astype(jnp.float32)
    w_e = jnp.ones((M,), jnp.float32)
    L = build_hgnn_laplacian(H, w_e)

    # nn.Linear-style init: U(-1/sqrt(C_in), 1/sqrt(C_in)); torch layout (Cout, Cin)
    bound = 1.0 / math.sqrt(C_in)
    theta = jax.random.uniform(k_w, (C_out, C_in), minval=-bound, maxval=bound,
                               dtype=jnp.float32)
    bias = jax.random.uniform(k_b, (1, C_out), minval=-bound, maxval=bound,
                              dtype=jnp.float32)

    # Small explicit tiles so the demo exercises multi-step reduction,
    # residual seeding, in-place finalize and in-kernel pl.ds slicing.
    jhconv = make_jhconv(theta.T, bias, L, tm=128, tk=128, use_bf16=True)
    out = jax.block_until_ready(jhconv(X))

    # Pure-JAX f32 reference
    Y_ref = X @ theta.T + bias
    ref = jnp.maximum(L @ Y_ref + Y_ref, 0.0)

    assert out.shape == (N, C_out) and out.dtype == jnp.float32
    # bf16 MXU operands + bf16 residual (f32 accumulation) -> relaxed tolerance
    assert jnp.allclose(out, ref, atol=2e-2, rtol=2e-2), "mismatch vs reference"

    print("KERNEL_OK")
</pallas_src>

<mosaic_0001>
module attributes {stable_mosaic.version = 11 : i64} {
  func.func @theta_kernel(%arg0: i32, %arg1: memref<128x32xf32, #tpu.memory_space<vmem>>, %arg2: memref<32x128xf32, #tpu.memory_space<vmem>>, %arg3: memref<1x128xf32, #tpu.memory_space<vmem>>, %arg4: memref<128x128xbf16, #tpu.memory_space<vmem>>) attributes {dimension_semantics = [#tpu.dimension_semantics<parallel>], iteration_bounds = array<i64: 3>, scalar_prefetch = 0 : i64, scratch_operands = 0 : i64, tpu.core_type = #tpu.core_type<tc>, window_params = [{transform_indices = @transform_0, window_bounds = array<i64: 128, 32>}, {pipeline_mode = #tpu.pipeline_mode<synchronous>, transform_indices = @transform_1, window_bounds = array<i64: 32, 128>}, {pipeline_mode = #tpu.pipeline_mode<synchronous>, transform_indices = @transform_2, window_bounds = array<i64: 1, 128>}, {transform_indices = @transform_3, window_bounds = array<i64: 128, 128>}]} {
    %c0 = arith.constant 0 : index
    %c0_0 = arith.constant 0 : index
    %0 = vector.load %arg1[%c0, %c0_0] : memref<128x32xf32, #tpu.memory_space<vmem>>, vector<128x32xf32>
    %c0_1 = arith.constant 0 : index
    %c0_2 = arith.constant 0 : index
    %1 = vector.load %arg2[%c0_1, %c0_2] : memref<32x128xf32, #tpu.memory_space<vmem>>, vector<32x128xf32>
    %cst = arith.constant dense<0.000000e+00> : vector<128x128xf32>
    %2 = tpu.matmul %0, %1, %cst {dimension_numbers = #tpu.dot_dimension_numbers<[1], [0], [0], [1], [0, 0, 1, 1], [], []>} : vector<128x32xf32>, vector<32x128xf32>, vector<128x128xf32> -> vector<128x128xf32>
    %c0_3 = arith.constant 0 : index
    %c0_4 = arith.constant 0 : index
    %3 = vector.load %arg3[%c0_3, %c0_4] : memref<1x128xf32, #tpu.memory_space<vmem>>, vector<1x128xf32>
    %4 = vector.broadcast %3 : vector<1x128xf32> to vector<128x128xf32>
    %5 = arith.addf %2, %4 : vector<128x128xf32>
    %6 = arith.truncf %5 : vector<128x128xf32> to vector<128x128xbf16>
    %c0_5 = arith.constant 0 : index
    %c0_6 = arith.constant 0 : index
    %7 = vector.load %arg4[%c0_5, %c0_6] : memref<128x128xbf16, #tpu.memory_space<vmem>>, vector<128x128xbf16>
    tpu.vector_store %arg4[%c0_5, %c0_6], %6 {strides = array<i32>} : memref<128x128xbf16, #tpu.memory_space<vmem>>, vector<128x128xbf16>,
    return
  }
  func.func @transform_0(%arg0: i32) -> (i32, i32) {
    %c0_i32 = arith.constant 0 : i32
    %c0_i32_0 = arith.constant 0 : i32
    return %arg0, %c0_i32 : i32, i32
  }
  func.func @transform_1(%arg0: i32) -> (i32, i32) {
    %c0_i32 = arith.constant 0 : i32
    %c0_i32_0 = arith.constant 0 : i32
    %c0_i32_1 = arith.constant 0 : i32
    return %c0_i32, %c0_i32_0 : i32, i32
  }
  func.func @transform_2(%arg0: i32) -> (i32, i32) {
    %c0_i32 = arith.constant 0 : i32
    %c0_i32_0 = arith.constant 0 : i32
    %c0_i32_1 = arith.constant 0 : i32
    return %c0_i32, %c0_i32_0 : i32, i32
  }
  func.func @transform_3(%arg0: i32) -> (i32, i32) {
    %c0_i32 = arith.constant 0 : i32
    %c0_i32_0 = arith.constant 0 : i32
    return %arg0, %c0_i32 : i32, i32
  }
}

module attributes {stable_mosaic.version = 11 : i64} {
  func.func @smooth_kernel(%arg0: i32, %arg1: i32, %arg2: memref<128x128xbf16, #tpu.memory_space<vmem>>, %arg3: memref<384x128xbf16, #tpu.memory_space<vmem>>, %arg4: memref<128x128xf32, #tpu.memory_space<vmem>>) attributes {dimension_semantics = [#tpu.dimension_semantics<parallel>, #tpu.dimension_semantics<arbitrary>], iteration_bounds = array<i64: 3, 3>, scalar_prefetch = 0 : i64, scratch_operands = 0 : i64, tpu.core_type = #tpu.core_type<tc>, window_params = [{transform_indices = @transform_0, window_bounds = array<i64: 128, 128>}, {pipeline_mode = #tpu.pipeline_mode<synchronous>, transform_indices = @transform_1, window_bounds = array<i64: 384, 128>}, {transform_indices = @transform_2, window_bounds = array<i64: 128, 128>}]} {
    %c0_i32 = arith.constant 0 : i32
    %0 = arith.cmpi eq, %arg1, %c0_i32 : i32
    %1 = arith.extui %0 : i1 to i32
    %c0_i32_0 = arith.constant 0 : i32
    %2 = arith.cmpi ne, %1, %c0_i32_0 : i32
    scf.if %2 {
      %c128_i32_8 = arith.constant 128 : i32
      %15 = arith.muli %arg0, %c128_i32_8 : i32
      %16 = tpu.assume_multiple %15, 128 : i32
      %17 = arith.index_cast %16 : i32 to index
      %c0_9 = arith.constant 0 : index
      %18 = vector.load %arg3[%17, %c0_9] : memref<384x128xbf16, #tpu.memory_space<vmem>>, vector<128x128xbf16>
      %19 = arith.extf %18 : vector<128x128xbf16> to vector<128x128xf32>
      %c0_10 = arith.constant 0 : index
      %c0_11 = arith.constant 0 : index
      %20 = vector.load %arg4[%c0_10, %c0_11] : memref<128x128xf32, #tpu.memory_space<vmem>>, vector<128x128xf32>
      tpu.vector_store %arg4[%c0_10, %c0_11], %19 {strides = array<i32>} : memref<128x128xf32, #tpu.memory_space<vmem>>, vector<128x128xf32>,
    } else {
    }
    %c128_i32 = arith.constant 128 : i32
    %3 = arith.muli %arg1, %c128_i32 : i32
    %4 = tpu.assume_multiple %3, 128 : i32
    %c0 = arith.constant 0 : index
    %c0_1 = arith.constant 0 : index
    %5 = vector.load %arg4[%c0, %c0_1] : memref<128x128xf32, #tpu.memory_space<vmem>>, vector<128x128xf32>
    %c0_2 = arith.constant 0 : index
    %c0_3 = arith.constant 0 : index
    %6 = vector.load %arg2[%c0_2, %c0_3] : memref<128x128xbf16, #tpu.memory_space<vmem>>, vector<128x128xbf16>
    %7 = arith.index_cast %4 : i32 to index
    %c0_4 = arith.constant 0 : index
    %8 = vector.load %arg3[%7, %c0_4] : memref<384x128xbf16, #tpu.memory_space<vmem>>, vector<128x128xbf16>
    %cst = arith.constant dense<0.000000e+00> : vector<128x128xf32>
    %9 = tpu.matmul %6, %8, %cst {dimension_numbers = #tpu.dot_dimension_numbers<[1], [0], [0], [1], [0, 0, 1, 1], [], []>} : vector<128x128xbf16>, vector<128x128xbf16>, vector<128x128xf32> -> vector<128x128xf32>
    %10 = arith.addf %5, %9 : vector<128x128xf32>
    %c0_5 = arith.constant 0 : index
    %c0_6 = arith.constant 0 : index
    %11 = vector.load %arg4[%c0_5, %c0_6] : memref<128x128xf32, #tpu.memory_space<vmem>>, vector<128x128xf32>
    tpu.vector_store %arg4[%c0_5, %c0_6], %10 {strides = array<i32>} : memref<128x128xf32, #tpu.memory_space<vmem>>, vector<128x128xf32>,
    %c2_i32 = arith.constant 2 : i32
    %12 = arith.cmpi eq, %arg1, %c2_i32 : i32
    %13 = arith.extui %12 : i1 to i32
    %c0_i32_7 = arith.constant 0 : i32
    %14 = arith.cmpi ne, %13, %c0_i32_7 : i32
    scf.if %14 {
      %c0_8 = arith.constant 0 : index
      %c0_9 = arith.constant 0 : index
      %15 = vector.load %arg4[%c0_8, %c0_9] : memref<128x128xf32, #tpu.memory_space<vmem>>, vector<128x128xf32>
      %cst_10 = arith.constant 0.000000e+00 : f32
      %16 = vector.broadcast %cst_10 : f32 to vector<128x128xf32>
      %17 = arith.maximumf %15, %16 : vector<128x128xf32>
      %c0_11 = arith.constant 0 : index
      %c0_12 = arith.constant 0 : index
      %18 = vector.load %arg4[%c0_11, %c0_12] : memref<128x128xf32, #tpu.memory_space<vmem>>, vector<128x128xf32>
      tpu.vector_store %arg4[%c0_11, %c0_12], %17 {strides = array<i32>} : memref<128x128xf32, #tpu.memory_space<vmem>>, vector<128x128xf32>,
    } else {
    }
    return
  }
  func.func @transform_0(%arg0: i32, %arg1: i32) -> (i32, i32) {
    %c0_i32 = arith.constant 0 : i32
    return %arg0, %arg1 : i32, i32
  }
  func.func @transform_1(%arg0: i32, %arg1: i32) -> (i32, i32) {
    %c0_i32 = arith.constant 0 : i32
    %c0_i32_0 = arith.constant 0 : i32
    %c0_i32_1 = arith.constant 0 : i32
    return %c0_i32, %c0_i32_0 : i32, i32
  }
  func.func @transform_2(%arg0: i32, %arg1: i32) -> (i32, i32) {
    %c0_i32 = arith.constant 0 : i32
    %c0_i32_0 = arith.constant 0 : i32
    return %arg0, %c0_i32 : i32, i32
  }
}

</mosaic_0001>

<bundles_post_ra>
// kernel: forward.2
= control target key start
LH: loop header
LB: loop body
LE: loop exit
PB: predicated region body
PF: predicated region fallthrough
CT: control target
= control target key end

     0   :  { %s738_s12 = smov 0   ;;  %s818_s0 = inlined_call_operand.vmem [shape: f32[384,32], index: 0, kind: input, shape index: {}]   ;;  %s819_s1 = inlined_call_operand.vmem [shape: f32[32,128], index: 1, kind: input, shape index: {}]   ;;  %s820_s2 = inlined_call_operand.vmem [shape: f32[1,128], index: 2, kind: input, shape index: {}]   ;;  %s821_s3 = inlined_call_operand.vmem [shape: bf16[384,128], index: 3, kind: output, shape index: {}]  }
   0x1 LB: > { %s531_s13 = sadd.s32 4294967295, %s716_s12   ;;  %p535_p0 = scmp.ge.s32.totalorder %s716_s12, 1  ;;  %s716_s12 = sphi %s738_s12, %s13_s12  }
   0x2   : > { %p138_p1 = scmp.lt.s32.totalorder %s716_s12, 4 }
   0x4   : > { %p139_p2 = pnand %p535_p0, %p138_p1 }
   0x5   : > { %v190_v0 = vld [vmem:[%s819_s1] sm:$0xff] (!%p139_p2)  ;;  %v191_v1 = vld [vmem:[%s819_s1 + $0x8] sm:$0xff] (!%p139_p2)  ;;  %v192_v2 = vld [vmem:[%s819_s1 + $0x10] sm:$0xff] (!%p139_p2)  ;;  %s536_s20 = sshll.u32 (!%p139_p2), %s531_s13, 4  ;;  %vm201_vm0 = vcmask (!%p139_p2), 261120  }
   0x6   : > { %142 = sbr.rel (%p139_p2) target bundleno = 249 (0xf9), region = 32  ;;  %v690_v3 = vpack.c.bf16 (!%p139_p2), %v191_v1, %v190_v0  ;;  %v193_v4 = vld [vmem:[%s819_s1 + $0x18] sm:$0xff] (!%p139_p2)  ;;  %p163_p3 = scmp.lt.s32.totalorder (!%p139_p2), %s536_s20, 47  ;;  %v540_v22 = vld [vmem:[%s820_s2] ss:$0 sm:$0xff] (!%p139_p2) }
   0x7   : > { %v694_v5 = vpack.c.bf16 (!%p139_p2), %v193_v4, %v192_v2 }
   0x8   : > { %691 = vmatprep.subr.bf16.mxu0 (!%p139_p2), %v690_v3  ;;  %698 = vmatprep.subr.bf16.mxu1 (!%p139_p2), %v690_v3 }
   0x9   : > { %693 = vmatpush3.bf16.msra.mxu0 (!%p139_p2), %v690_v3  ;;  %700 = vmatpush3.bf16.msra.mxu1 (!%p139_p2), %v690_v3 }
   0xa   : > { %695 = vmatprep.subr.bf16.mxu0 (!%p139_p2), %v694_v5  ;;  %699 = vmatprep.subr.bf16.mxu1 (!%p139_p2), %v694_v5 }
   0xd   : > { %s823_s20 = smov (!%p163_p3, %s536_s20), 47  ;;  %697 = vmatpush3.bf16.msra.mxu0 %v694_v5  ;;  %701 = vmatpush3.bf16.msra.mxu1 %v694_v5 }
   0xe   : > { %s537_s23 = sshll.u32 %s823_s20, 3  ;;  %s539_s29 = sshll.u32 %s823_s20, 2 }
   0xf   : > { %s764_s26 = scalar_lea.vmem %s818_s0, %s537_s23  ;;  %s805_s5 = scalar_lea.vmem %s821_s3, %s539_s29 }
  0x10   : > { %v174_v6 = vld [vmem:[%s764_s26] sm:$0xff]  ;;  %v175_v8 = vld [vmem:[%s764_s26 + $0x8] sm:$0xff]  ;;  %v176_v10 = vld [vmem:[%s764_s26 + $0x10] sm:$0xff] }
  0x11   : > { %v182_v7 = vld [vmem:[%s764_s26 + $0x40] sm:$0xff]  ;;  %v183_v9 = vld [vmem:[%s764_s26 + $0x48] sm:$0xff]  ;;  %666 = vmatprep.mubr.msk.f32.mxu0 %vm201_vm0, %v174_v6  ;;  %v184_v11 = vld [vmem:[%s764_s26 + $0x50] sm:$0xff] }
  0x12   : > { %678 = vmatprep.mubr.msk.f32.mxu1 %vm201_vm0, %v182_v7  ;;  %667 = vmatmul.mubr.msk.f32.vlgmr.msra.gmra.mrb[0].mxu0 %vm201_vm0, %v175_v8  ;;  %v177_v12 = vld [vmem:[%s764_s26 + $0x18] sm:$0xff]  ;;  %v178_v14 = vld [vmem:[%s764_s26 + $0x20] sm:$0xff]  ;;  %v179_v16 = vld [vmem:[%s764_s26 + $0x28] sm:$0xff] }
  0x13   : > { %679 = vmatmul.mubr.msk.f32.vlgmr.msra.gmra.mrb[0].mxu1 %vm201_vm0, %v183_v9  ;;  %669 = vmatprep.mubr.msk.f32.mxu0 %vm201_vm0, %v176_v10  ;;  %v185_v13 = vld [vmem:[%s764_s26 + $0x58] sm:$0xff]  ;;  %v186_v15 = vld [vmem:[%s764_s26 + $0x60] sm:$0xff]  ;;  %v187_v17 = vld [vmem:[%s764_s26 + $0x68] sm:$0xff] }
  0x14   : > { %681 = vmatprep.mubr.msk.f32.mxu1 %vm201_vm0, %v184_v11  ;;  %v180_v18 = vld [vmem:[%s764_s26 + $0x30] sm:$0xff]  ;;  %v181_v20 = vld [vmem:[%s764_s26 + $0x38] sm:$0xff] }
  0x15   : > { %v188_v19 = vld [vmem:[%s764_s26 + $0x70] sm:$0xff]  ;;  %v189_v21 = vld [vmem:[%s764_s26 + $0x78] sm:$0xff] }
  0x16   : > { %670 = vmatmul.mubr.msk.f32.gmra.mrb[2].mxu0 %vm201_vm0, %v177_v12 }
  0x17   : > { %682 = vmatmul.mubr.msk.f32.gmra.mrb[2].mxu1 %vm201_vm0, %v185_v13  ;;  %672 = vmatprep.mubr.msk.f32.mxu0 %vm201_vm0, %v178_v14 }
  0x18   : > { %684 = vmatprep.mubr.msk.f32.mxu1 %vm201_vm0, %v186_v15 }
  0x1a   : > { %673 = vmatmul.mubr.msk.f32.gmra.mrb[4].mxu0 %vm201_vm0, %v179_v16 }
  0x1b   : > { %685 = vmatmul.mubr.msk.f32.gmra.mrb[4].mxu1 %vm201_vm0, %v187_v17  ;;  %675 = vmatprep.mubr.msk.f32.mxu0 %vm201_vm0, %v180_v18 }
  0x1c   : > { %687 = vmatprep.mubr.msk.f32.mxu1 %vm201_vm0, %v188_v19 }
  0x1e   : > { %676 = vmatmul.mubr.msk.f32.gmra.mrb[6].mxu0 %vm201_vm0, %v181_v20 }
  0x1f   : > { %688 = vmatmul.mubr.msk.f32.gmra.mrb[6].mxu1 %vm201_vm0, %v189_v21 }
  0xe5   : > { %v668_v23 = vpop.f32.mrb[0].mxu0 }
  0xe6   : > { %v680_v24 = vpop.f32.mrb[0].mxu1  ;;  %v322_v25 = vadd.f32 %v668_v23, %v540_v22  ;;  %v316_v27 = vpop.f32.mrb[1].mxu0 }
  0xe7   : > { %v362_v26 = vadd.f32 %v680_v24, %v540_v22  ;;  %v356_v28 = vpop.f32.mrb[1].mxu1  ;;  %v317_v29 = vadd.f32 %v540_v22, %v316_v27 }
  0xe8   : > { %v357_v30 = vadd.f32 %v540_v22, %v356_v28 }
  0xe9   : > { %v594_v31 = vpack.c.bf16 %v322_v25, %v317_v29  ;;  %v671_v33 = vpop.f32.mrb[2].mxu0 }
  0xea   : > { %v614_v32 = vpack.c.bf16 %v362_v26, %v357_v30  ;;  %v683_v34 = vpop.f32.mrb[2].mxu1  ;;  %v332_v35 = vadd.f32 %v671_v33, %v540_v22  ;;  %v326_v37 = vpop.f32.mrb[3].mxu0 }
  0xeb   : > { %v372_v36 = vadd.f32 %v683_v34, %v540_v22  ;;  %v366_v38 = vpop.f32.mrb[3].mxu1  ;;  %595 = vst [vmem:[%s805_s5] sm:$0xff] %v594_v31   ;;  %v327_v39 = vadd.f32 %v540_v22, %v326_v37 }
  0xec   : > { %634 = vst [vmem:[%s805_s5 + $0x20] sm:$0xff] %v614_v32   ;;  %v367_v40 = vadd.f32 %v540_v22, %v366_v38 }
  0xed   : > { %v599_v41 = vpack.c.bf16 %v332_v35, %v327_v39  ;;  %v674_v43 = vpop.f32.mrb[4].mxu0 }
  0xee   : > { %v619_v42 = vpack.c.bf16 %v372_v36, %v367_v40  ;;  %v686_v44 = vpop.f32.mrb[4].mxu1  ;;  %v342_v45 = vadd.f32 %v674_v43, %v540_v22  ;;  %v336_v47 = vpop.f32.mrb[5].mxu0 }
  0xef   : > { %v382_v46 = vadd.f32 %v686_v44, %v540_v22  ;;  %v376_v48 = vpop.f32.mrb[5].mxu1  ;;  %631 = vst [vmem:[%s805_s5 + $0x8] sm:$0xff] %v599_v41   ;;  %v337_v49 = vadd.f32 %v540_v22, %v336_v47 }
  0xf0   : > { %635 = vst [vmem:[%s805_s5 + $0x28] sm:$0xff] %v619_v42   ;;  %v377_v50 = vadd.f32 %v540_v22, %v376_v48 }
  0xf1   : > { %v604_v51 = vpack.c.bf16 %v342_v45, %v337_v49  ;;  %v677_v53 = vpop.f32.mrb[6].mxu0 }
  0xf2   : > { %v624_v52 = vpack.c.bf16 %v382_v46, %v377_v50  ;;  %v689_v54 = vpop.f32.mrb[6].mxu1  ;;  %v352_v55 = vadd.f32 %v677_v53, %v540_v22  ;;  %v346_v57 = vpop.f32.mrb[7].mxu0 }
  0xf3   : > { %v392_v56 = vadd.f32 %v689_v54, %v540_v22  ;;  %v386_v58 = vpop.f32.mrb[7].mxu1  ;;  %632 = vst [vmem:[%s805_s5 + $0x10] sm:$0xff] %v604_v51   ;;  %v347_v59 = vadd.f32 %v540_v22, %v346_v57 }
  0xf4   : > { %636 = vst [vmem:[%s805_s5 + $0x30] sm:$0xff] %v624_v52   ;;  %v387_v60 = vadd.f32 %v540_v22, %v386_v58 }
  0xf5   : > { %v609_v61 = vpack.c.bf16 %v352_v55, %v347_v59 }
  0xf6   : > { %v629_v62 = vpack.c.bf16 %v392_v56, %v387_v60 }
  0xf7   : > { %633 = vst [vmem:[%s805_s5 + $0x18] sm:$0xff] %v609_v61  }
  0xf8   : > { %637 = vst [vmem:[%s805_s5 + $0x38] sm:$0xff] %v629_v62  }
  0xf9 PF: > { %s13_s12 = sadd.s32 1, %s716_s12  }
  0xfa   : > { %p10_p4 = scmp.ge.s32.totalorder %s13_s12, 5  }
  0xfc   :  { %12 = sbr.rel (!%p10_p4) target bundleno = 1 (0x1), region = 62 }

// kernel: forward.3
= control target key start
LH: loop header
LB: loop body
LE: loop exit
PB: predicated region body
PF: predicated region fallthrough
CT: control target
= control target key end

     0   :  { %s1015_s9 = smov 0   ;;  %s1017_s10 = smov 0   ;;  %s1233_s0 = inlined_call_operand.vmem [shape: bf16[384,384], index: 0, kind: input, shape index: {}]   ;;  %s1234_s1 = inlined_call_operand.vmem [shape: bf16[384,128], index: 1, kind: input, shape index: {}]   ;;  %s1235_s2 = inlined_call_operand.vmem [shape: f32[384,128], index: 2, kind: output, shape index: {}]  }
   0x1   :  { %s1019_s11 = smov 0   ;;  %s1021_s12 = smov 0  }
   0x2   :  { %s1023_s13 = smov 0   ;;  %s1025_s14 = smov 0  }
   0x3   :  { %s1027_s15 = smov 0  }
   0x4 LB: > { %s21_s16 = sadd.s32 1, %s990_s13  ;;  %s24_s17 = sadd.s32 1, %s994_s14  ;;  %s998_s15 = sphi %s1027_s15, %s12_s15   ;;  %s994_s14 = sphi %s1025_s14, %s1241_s14   ;;  %s990_s13 = sphi %s1023_s13, %s1240_s13   ;;  %s986_s12 = sphi %s1021_s12, %s1239_s12   ;;  %s982_s11 = sphi %s1019_s11, %s1238_s11   ;;  %s978_s10 = sphi %s1017_s10, %s1237_s10   ;;  %s974_s9 = sphi %s1015_s9, %s1236_s9  }
   0x5   : > { %p22_p0 = scmp.ge.s32.totalorder %s21_s16, 3  ;;  %p40_p1 = scmp.ne.s32.totalorder %s978_s10, %s974_s9 }
   0x6   : > { %p41_p2 = scmp.eq.s32.totalorder %s998_s15, 0  ;;  %s33_s21 = sadd.s32 1, %s978_s10 }
   0x7   : > { %s1243_s16 = smov (%p22_p0, %s21_s16), 0  ;;  %s1245_s17 = smov (!%p22_p0, %s24_s17), %s994_s14 }
   0x8   : > { %p42_p3 = por %p41_p2, %p40_p1  ;;  %p26_p4 = scmp.ge.s32.totalorder %s1245_s17, 3 }
   0x9   : > { %s29_s18 = ssub.s32 %s990_s13, %s1243_s16  ;;  %p735_p6 = scmp.ge.s32.totalorder %s998_s15, 9 }
   0xa   : > { %s1247_s17 = smov (%p26_p4, %s1245_s17), 0 }
   0xb   : > { %s28_s19 = ssub.s32 %s994_s14, %s1247_s17  ;;  %116 = sbr.rel (%p735_p6) target bundleno = 35 (0x23), region = 20 }
   0xc   : > { %s30_s20 = sor.u32 %s29_s18, %s28_s19 }
   0xd   : > { %p31_p5 = scmp.eq.s32.totalorder %s30_s20, 0 }
   0xf   : > { %s1066_s22 = scalar_select %p31_p5, %s978_s10, %s33_s21  }
  0x12   : > { %119 = sbr.rel (!%p42_p3) target bundleno = 35 (0x23), region = 24  ;;  %s121_s23 = sand.u32 (%p42_p3), 1, %s978_s10  }
  0x13   : > { %s871_s24 = smul.u32 (%p42_p3), 48, %s994_s14  ;;  %s736_s25 = sshll.u32 (%p42_p3), %s121_s23, 6 }
  0x14   : > { %s123_s3 = scalar_lea.vmem (%p42_p3), [#allocation2], %s736_s25 }
  0x15   : > { %s126_s26 = sadd.s32 (%p42_p3), %s990_s13, %s871_s24 }
  0x16   : > { %s739_s27 = sshll.u32 (%p42_p3), %s126_s26, 2 }
  0x17   : > { %s1075_s30 = scalar_lea.vmem (%p42_p3), %s1233_s0, %s739_s27 }
  0x18   : > { %v144_v0 = vld [vmem:[%s1075_s30] sm:$0xf] (%p42_p3)  ;;  %v146_v1 = vld [vmem:[%s1075_s30 + $0xc] sm:$0xf] (%p42_p3)  ;;  %v148_v2 = vld [vmem:[%s1075_s30 + $0x18] sm:$0xf] (%p42_p3) }
  0x19   : > { %145 = vst [vmem:[%s123_s3] sm:$0xf] %v144_v0  ;;  %147 = vst [vmem:[%s123_s3 + $0x4] sm:$0xf] %v146_v1  ;;  %v150_v3 = vld [vmem:[%s1075_s30 + $0x24] sm:$0xf] }
  0x1a   : > { %149 = vst [vmem:[%s123_s3 + $0x8] sm:$0xf] %v148_v2  ;;  %v152_v4 = vld [vmem:[%s1075_s30 + $0x30] sm:$0xf]  ;;  %v154_v5 = vld [vmem:[%s1075_s30 + $0x3c] sm:$0xf] }
  0x1b   : > { %151 = vst [vmem:[%s123_s3 + $0xc] sm:$0xf] %v150_v3  ;;  %153 = vst [vmem:[%s123_s3 + $0x10] sm:$0xf] %v152_v4  ;;  %v156_v6 = vld [vmem:[%s1075_s30 + $0x48] sm:$0xf] }
  0x1c   : > { %155 = vst [vmem:[%s123_s3 + $0x14] sm:$0xf] %v154_v5  ;;  %v158_v7 = vld [vmem:[%s1075_s30 + $0x54] sm:$0xf]  ;;  %v160_v8 = vld [vmem:[%s1075_s30 + $0x60] sm:$0xf] }
  0x1d   : > { %157 = vst [vmem:[%s123_s3 + $0x18] sm:$0xf] %v156_v6  ;;  %159 = vst [vmem:[%s123_s3 + $0x1c] sm:$0xf] %v158_v7  ;;  %v162_v9 = vld [vmem:[%s1075_s30 + $0x6c] sm:$0xf] }
  0x1e   : > { %161 = vst [vmem:[%s123_s3 + $0x20] sm:$0xf] %v160_v8  ;;  %v164_v10 = vld [vmem:[%s1075_s30 + $0x78] sm:$0xf]  ;;  %v166_v11 = vld [vmem:[%s1075_s30 + $0x84] sm:$0xf] }
  0x1f   : > { %163 = vst [vmem:[%s123_s3 + $0x24] sm:$0xf] %v162_v9  ;;  %165 = vst [vmem:[%s123_s3 + $0x28] sm:$0xf] %v164_v10  ;;  %v168_v12 = vld [vmem:[%s1075_s30 + $0x90] sm:$0xf] }
  0x20   : > { %167 = vst [vmem:[%s123_s3 + $0x2c] sm:$0xf] %v166_v11  ;;  %v170_v13 = vld [vmem:[%s1075_s30 + $0x9c] sm:$0xf]  ;;  %v172_v14 = vld [vmem:[%s1075_s30 + $0xa8] sm:$0xf] }
  0x21   : > { %169 = vst [vmem:[%s123_s3 + $0x30] sm:$0xf] %v168_v12  ;;  %171 = vst [vmem:[%s123_s3 + $0x34] sm:$0xf] %v170_v13  ;;  %v174_v15 = vld [vmem:[%s1075_s30 + $0xb4] sm:$0xf] }
  0x22   : > { %173 = vst [vmem:[%s123_s3 + $0x38] sm:$0xf] %v172_v14  ;;  %175 = vst [vmem:[%s123_s3 + $0x3c] sm:$0xf] %v174_v15 }
  0x23 PF: > { %p740_p7 = scmp.ge.s32.totalorder %s998_s15, 1  ;;  %p229_p8 = scmp.lt.s32.totalorder %s998_s15, 10 }
  0x25   : > { %p230_p9 = pnand %p740_p7, %p229_p8 }
  0x26   : > { %s236_s4 = sand.u32 (!%p230_p9), 1, %s974_s9   ;;  %s742_s5 = sshll.u32 (!%p230_p9), %s986_s12, 4 }
  0x27   : > { %233 = sbr.rel (%p230_p9) target bundleno = 336 (0x150), region = 65  ;;  %s741_s6 = sshll.u32 (!%p230_p9), %s236_s4, 6 }
  0x28   : > { %p259_p10 = scmp.lt.s32.totalorder (!%p230_p9), %s742_s5, 47  ;;  %s1102_s20 = scalar_lea.vmem (!%p230_p9), [#allocation2], %s741_s6 }
  0x29   : > { %p744_p11 = scmp.ne.s32.totalorder (!%p230_p9), %s982_s11, 0 }
  0x2e   : > { %s1249_s5 = smov (!%p259_p10, %s742_s5), 47  ;;  %268 = sbr.rel (%p744_p11) target bundleno = 62 (0x3e), region = 73 }
  0x2f   : > { %s743_s7 = sshll.u32 %s1249_s5, 3  ;;  %s745_s21 = sshll.u32 (!%p744_p11), %s986_s12, 7 }
  0x30   : > { %s1100_s19 = scalar_lea.vmem %s1235_s2, %s743_s7  ;;  %s270_s23 = sshra.s32 (!%p744_p11), %s745_s21, 3 }
  0x31   : > { %s746_s24 = sshll.u32 (!%p744_p11), %s270_s23, 2 }
  0x32   : > { %s273_s26 = scalar_lea.vmem (!%p744_p11), %s1234_s1, %s746_s24 }
  0x33   : > { %v769_v16 = vld [vmem:[%s273_s26] sm:$0xff] (!%p744_p11)   ;;  %v800_v17 = vld [vmem:[%s273_s26 + $0x8] sm:$0xff] (!%p744_p11)   ;;  %v801_v18 = vld [vmem:[%s273_s26 + $0x10] sm:$0xff] (!%p744_p11)  }
  0x34   : > { %v770_v19 = vunpack.c.l.bf16 (!%p744_p11), %v769_v16  ;;  %v771_v20 = vunpack.c.h.bf16 (!%p744_p11), %v769_v16  ;;  %v774_v21 = vunpack.c.l.bf16 (!%p744_p11), %v800_v17  ;;  %v775_v22 = vunpack.c.h.bf16 (!%p744_p11), %v800_v17  ;;  %v802_v23 = vld [vmem:[%s273_s26 + $0x18] sm:$0xff] (!%p744_p11)   ;;  %v803_v24 = vld [vmem:[%s273_s26 + $0x20] sm:$0xff] (!%p744_p11)   ;;  %v804_v25 = vld [vmem:[%s273_s26 + $0x28] sm:$0xff] (!%p744_p11)  }
  0x35   : > { %v778_v26 = vunpack.c.l.bf16 %v801_v18  ;;  %v779_v27 = vunpack.c.h.bf16 %v801_v18  ;;  %v782_v28 = vunpack.c.l.bf16 %v802_v23  ;;  %v783_v29 = vunpack.c.h.bf16 %v802_v23  ;;  %v805_v30 = vld [vmem:[%s273_s26 + $0x30] sm:$0xff]   ;;  %v806_v31 = vld [vmem:[%s273_s26 + $0x38] sm:$0xff]  }
  0x36   : > { %306 = vst [vmem:[%s1100_s19] sm:$0xff] %v770_v19  ;;  %307 = vst [vmem:[%s1100_s19 + $0x8] sm:$0xff] %v771_v20  ;;  %v786_v32 = vunpack.c.l.bf16 %v803_v24  ;;  %v787_v33 = vunpack.c.h.bf16 %v803_v24  ;;  %v790_v34 = vunpack.c.l.bf16 %v804_v25  ;;  %v791_v35 = vunpack.c.h.bf16 %v804_v25 }
  0x37   : > { %308 = vst [vmem:[%s1100_s19 + $0x10] sm:$0xff] %v774_v21  ;;  %309 = vst [vmem:[%s1100_s19 + $0x18] sm:$0xff] %v775_v22  ;;  %v794_v36 = vunpack.c.l.bf16 %v805_v30  ;;  %v795_v37 = vunpack.c.h.bf16 %v805_v30  ;;  %v798_v38 = vunpack.c.l.bf16 %v806_v31  ;;  %v799_v39 = vunpack.c.h.bf16 %v806_v31 }
  0x38   : > { %310 = vst [vmem:[%s1100_s19 + $0x20] sm:$0xff] %v778_v26  ;;  %311 = vst [vmem:[%s1100_s19 + $0x28] sm:$0xff] %v779_v27 }
  0x39   : > { %312 = vst [vmem:[%s1100_s19 + $0x30] sm:$0xff] %v782_v28  ;;  %313 = vst [vmem:[%s1100_s19 + $0x38] sm:$0xff] %v783_v29 }
  0x3a   : > { %314 = vst [vmem:[%s1100_s19 + $0x40] sm:$0xff] %v786_v32  ;;  %315 = vst [vmem:[%s1100_s19 + $0x48] sm:$0xff] %v787_v33 }
  0x3b   : > { %316 = vst [vmem:[%s1100_s19 + $0x50] sm:$0xff] %v790_v34  ;;  %317 = vst [vmem:[%s1100_s19 + $0x58] sm:$0xff] %v791_v35 }
  0x3c   : > { %318 = vst [vmem:[%s1100_s19 + $0x60] sm:$0xff] %v794_v36  ;;  %319 = vst [vmem:[%s1100_s19 + $0x68] sm:$0xff] %v795_v37 }
  0x3d   : > { %320 = vst [vmem:[%s1100_s19 + $0x70] sm:$0xff] %v798_v38  ;;  %321 = vst [vmem:[%s1100_s19 + $0x78] sm:$0xff] %v799_v39 }
  0x3e PF: > { %s747_s12 = sshll.u32 %s982_s11, 7  ;;  %v936_v40 = vld [vmem:[%s1102_s20] sm:$0xff]   ;;  %v938_v50 = vld [vmem:[%s1102_s20 + $0x8] sm:$0xff]   ;;  %v940_v52 = vld [vmem:[%s1102_s20 + $0x10] sm:$0xff]   ;;  %p765_p12 = scmp.ne.s32.totalorder %s982_s11, 2 }
  0x3f   : > { %s355_s27 = sshra.s32 %s747_s12, 3  ;;  %v937_v41 = vld [vmem:[%s1102_s20 + $0x20] sm:$0xff]   ;;  %839 = vmatprep.mubr.bf16.mxu0 %v936_v40  ;;  %v939_v51 = vld [vmem:[%s1102_s20 + $0x28] sm:$0xff]   ;;  %v941_v53 = vld [vmem:[%s1102_s20 + $0x30] sm:$0xff]  }
  0x40   : > { %s748_s28 = sshll.u32 %s355_s27, 2  ;;  %847 = vmatprep.mubr.bf16.mxu1 %v937_v41  ;;  %v942_v54 = vld [vmem:[%s1102_s20 + $0x18] sm:$0xff]   ;;  %v325_v56 = vld [vmem:[%s1100_s19 + $0x10] sm:$0xff]  ;;  %v323_v58 = vld [vmem:[%s1100_s19] sm:$0xff] }
  0x41   : > { %s1131_s3 = scalar_lea.vmem %s1234_s1, %s748_s28  ;;  %v943_v55 = vld [vmem:[%s1102_s20 + $0x38] sm:$0xff]   ;;  %v331_v59 = vld [vmem:[%s1100_s19 + $0x40] sm:$0xff]  ;;  %v324_v4 = vld [vmem:[%s1100_s19 + $0x8] sm:$0xff] }
  0x42   : > { %v928_v42 = vld [vmem:[%s1131_s3] sm:$0xff]   ;;  %v929_v43 = vld [vmem:[%s1131_s3 + $0x8] sm:$0xff]   ;;  %v930_v44 = vld [vmem:[%s1131_s3 + $0x10] sm:$0xff]  }
  0x43   : > { %823 = vmatprep.subr.bf16.mxu0 %v928_v42  ;;  %855 = vmatprep.subr.bf16.mxu1 %v928_v42  ;;  %v931_v45 = vld [vmem:[%s1131_s3 + $0x18] sm:$0xff]   ;;  %v932_v46 = vld [vmem:[%s1131_s3 + $0x20] sm:$0xff]   ;;  %v933_v47 = vld [vmem:[%s1131_s3 + $0x28] sm:$0xff]  }
  0x44   : > { %824 = vmatpush3.bf16.msra.mxu0 %v928_v42  ;;  %863 = vmatpush3.bf16.msra.mxu1 %v928_v42  ;;  %v934_v48 = vld [vmem:[%s1131_s3 + $0x30] sm:$0xff]   ;;  %v935_v49 = vld [vmem:[%s1131_s3 + $0x38] sm:$0xff]   ;;  %v332_v5 = vld [vmem:[%s1100_s19 + $0x48] sm:$0xff] }
  0x45   : > { %825 = vmatprep.subr.bf16.mxu0 %v929_v43  ;;  %856 = vmatprep.subr.bf16.mxu1 %v929_v43  ;;  %v333_v57 = vld [vmem:[%s1100_s19 + $0x50] sm:$0xff]  ;;  %v326_v62 = vld [vmem:[%s1100_s19 + $0x18] sm:$0xff]  ;;  %v327_v18 = vld [vmem:[%s1100_s19 + $0x20] sm:$0xff] }
  0x46   : > { %v334_v63 = vld [vmem:[%s1100_s19 + $0x58] sm:$0xff]  ;;  %v329_v16 = vld [vmem:[%s1100_s19 + $0x30] sm:$0xff]  ;;  %v335_v19 = vld [vmem:[%s1100_s19 + $0x60] sm:$0xff] }
  0x47   : > { %v337_v17 = vld [vmem:[%s1100_s19 + $0x70] sm:$0xff]  ;;  %v330_v22 = vld [vmem:[%s1100_s19 + $0x38] sm:$0xff]  ;;  %v328_v28 = vld [vmem:[%s1100_s19 + $0x28] sm:$0xff] }
  0x48   : > { %826 = vmatpush3.bf16.msra.mxu0 %v929_v43  ;;  %864 = vmatpush3.bf16.msra.mxu1 %v929_v43  ;;  %v338_v23 = vld [vmem:[%s1100_s19 + $0x78] sm:$0xff]  ;;  %v336_v29 = vld [vmem:[%s1100_s19 + $0x68] sm:$0xff] }
  0x49   : > { %827 = vmatprep.subr.bf16.mxu0 %v930_v44  ;;  %857 = vmatprep.subr.bf16.mxu1 %v930_v44 }
  0x4c   : > { %828 = vmatpush3.bf16.msra.mxu0 %v930_v44  ;;  %865 = vmatpush3.bf16.msra.mxu1 %v930_v44 }
  0x4d   : > { %829 = vmatprep.subr.bf16.mxu0 %v931_v45  ;;  %858 = vmatprep.subr.bf16.mxu1 %v931_v45 }
  0x50   : > { %830 = vmatpush3.bf16.msra.mxu0 %v931_v45  ;;  %866 = vmatpush3.bf16.msra.mxu1 %v931_v45 }
  0x51   : > { %831 = vmatprep.subr.bf16.mxu0 %v932_v46  ;;  %859 = vmatprep.subr.bf16.mxu1 %v932_v46 }
  0x54   : > { %832 = vmatpush3.bf16.msra.mxu0 %v932_v46  ;;  %867 = vmatpush3.bf16.msra.mxu1 %v932_v46 }
  0x55   : > { %833 = vmatprep.subr.bf16.mxu0 %v933_v47  ;;  %860 = vmatprep.subr.bf16.mxu1 %v933_v47 }
  0x58   : > { %834 = vmatpush3.bf16.msra.mxu0 %v933_v47  ;;  %868 = vmatpush3.bf16.msra.mxu1 %v933_v47 }
  0x59   : > { %835 = vmatprep.subr.bf16.mxu0 %v934_v48  ;;  %861 = vmatprep.subr.bf16.mxu1 %v934_v48 }
  0x5c   : > { %836 = vmatpush3.bf16.msra.mxu0 %v934_v48  ;;  %869 = vmatpush3.bf16.msra.mxu1 %v934_v48 }
  0x5d   : > { %837 = vmatprep.subr.bf16.mxu0 %v935_v49  ;;  %862 = vmatprep.subr.bf16.mxu1 %v935_v49 }
  0x60   : > { %838 = vmatpush3.bf16.msra.mxu0 %v935_v49  ;;  %870 = vmatpush3.bf16.msra.mxu1 %v935_v49 }
  0x63   : > { %840 = vmatmul.mubr.bf16.vlgmr.msra.gmra.mrb[0].mxu0 %v938_v50  ;;  %848 = vmatmul.mubr.bf16.vlgmr.msra.gmra.mrb[0].mxu1 %v939_v51 }
  0x64   : > { %843 = vmatprep.mubr.bf16.mxu0 %v940_v52  ;;  %851 = vmatprep.mubr.bf16.mxu1 %v941_v53 }
  0x6b   : > { %844 = vmatmul.mubr.bf16.gmra.mrb[4].mxu0 %v942_v54  ;;  %852 = vmatmul.mubr.bf16.gmra.mrb[4].mxu1 %v943_v55 }
 0x136   : > { %v841_v60 = vpop.f32.mrb[0].mxu0  ;;  %v849_v61 = vpop.f32.mrb[0].mxu1 }
 0x137   : > { %v570_v0 = vadd.f32 %v841_v60, %v325_v56  ;;  %v578_v1 = vadd.f32 %v849_v61, %v333_v57  ;;  %v505_v2 = vpop.f32.mrb[1].mxu0  ;;  %v537_v3 = vpop.f32.mrb[1].mxu1 }
 0x138   : > { %v568_v6 = vadd.f32 %v505_v2, %v323_v58  ;;  %v576_v7 = vadd.f32 %v537_v3, %v331_v59  ;;  %v842_v8 = vpop.f32.mrb[2].mxu0  ;;  %v850_v9 = vpop.f32.mrb[2].mxu1 }
 0x139   : > { %586 = vst [vmem:[%s1100_s19 + $0x10] sm:$0xff] %v570_v0  ;;  %594 = vst [vmem:[%s1100_s19 + $0x50] sm:$0xff] %v578_v1  ;;  %v571_v10 = vadd.f32 %v842_v8, %v326_v62  ;;  %v579_v11 = vadd.f32 %v850_v9, %v334_v63  ;;  %v508_v12 = vpop.f32.mrb[3].mxu0  ;;  %v540_v13 = vpop.f32.mrb[3].mxu1 }
 0x13a   : > { %584 = vst [vmem:[%s1100_s19] sm:$0xff] %v568_v6  ;;  %592 = vst [vmem:[%s1100_s19 + $0x40] sm:$0xff] %v576_v7  ;;  %v569_v14 = vadd.f32 %v508_v12, %v324_v4  ;;  %v577_v15 = vadd.f32 %v540_v13, %v332_v5 }
 0x13b   : > { %587 = vst [vmem:[%s1100_s19 + $0x18] sm:$0xff] %v571_v10  ;;  %595 = vst [vmem:[%s1100_s19 + $0x58] sm:$0xff] %v579_v11 }
 0x13c   : > { %585 = vst [vmem:[%s1100_s19 + $0x8] sm:$0xff] %v569_v14  ;;  %593 = vst [vmem:[%s1100_s19 + $0x48] sm:$0xff] %v577_v15 }
 0x13e   : > { %v845_v20 = vpop.f32.mrb[4].mxu0  ;;  %v853_v21 = vpop.f32.mrb[4].mxu1  ;;  %603 = sbr.rel (%p765_p12) target bundleno = 336 (0x150), region = 77 }
 0x13f   : > { %v574_v24 = vadd.f32 %v845_v20, %v329_v16  ;;  %v582_v25 = vadd.f32 %v853_v21, %v337_v17  ;;  %v521_v26 = vpop.f32.mrb[5].mxu0  ;;  %v553_v27 = vpop.f32.mrb[5].mxu1 }
 0x140   : > { %v572_v30 = vadd.f32 %v521_v26, %v327_v18  ;;  %v580_v31 = vadd.f32 %v553_v27, %v335_v19  ;;  %v846_v32 = vpop.f32.mrb[6].mxu0  ;;  %v854_v33 = vpop.f32.mrb[6].mxu1  ;;  %v606_v42 = vld [vmem:[%s1100_s19 + $0x10] sm:$0xff] (!%p765_p12) }
 0x141   : > { %590 = vst [vmem:[%s1100_s19 + $0x30] sm:$0xff] %v574_v24  ;;  %598 = vst [vmem:[%s1100_s19 + $0x70] sm:$0xff] %v582_v25  ;;  %v575_v34 = vadd.f32 %v846_v32, %v330_v22  ;;  %v583_v35 = vadd.f32 %v854_v33, %v338_v23  ;;  %v524_v36 = vpop.f32.mrb[7].mxu0  ;;  %v556_v37 = vpop.f32.mrb[7].mxu1  ;;  %v604_v40 = vld [vmem:[%s1100_s19] sm:$0xff] (!%p765_p12)  ;;  %v622_v45 = vmax.f32 (!%p765_p12), %v606_v42, 0.0 }
 0x142   : > { %588 = vst [vmem:[%s1100_s19 + $0x20] sm:$0xff] %v572_v30  ;;  %596 = vst [vmem:[%s1100_s19 + $0x60] sm:$0xff] %v580_v31  ;;  %v573_v38 = vadd.f32 %v524_v36, %v328_v28  ;;  %v581_v39 = vadd.f32 %v556_v37, %v336_v29  ;;  %v620_v43 = vmax.f32 (!%p765_p12), %v604_v40, 0.0  ;;  %v607_v46 = vld [vmem:[%s1100_s19 + $0x18] sm:$0xff] (!%p765_p12)  ;;  %v612_v54 = vld [vmem:[%s1100_s19 + $0x40] sm:$0xff] (!%p765_p12) }
 0x143   : > { %591 = vst [vmem:[%s1100_s19 + $0x38] sm:$0xff] %v575_v34  ;;  %599 = vst [vmem:[%s1100_s19 + $0x78] sm:$0xff] %v583_v35  ;;  %v605_v41 = vld [vmem:[%s1100_s19 + $0x8] sm:$0xff] (!%p765_p12)  ;;  %v623_v49 = vmax.f32 (!%p765_p12), %v607_v46, 0.0  ;;  %v628_v57 = vmax.f32 (!%p765_p12), %v612_v54, 0.0  ;;  %v614_v59 = vld [vmem:[%s1100_s19 + $0x50] sm:$0xff] (!%p765_p12) }
 0x144   : > { %589 = vst [vmem:[%s1100_s19 + $0x28] sm:$0xff] %v573_v38  ;;  %597 = vst [vmem:[%s1100_s19 + $0x68] sm:$0xff] %v581_v39  ;;  %v621_v44 = vmax.f32 (!%p765_p12), %v605_v41, 0.0  ;;  %v613_v58 = vld [vmem:[%s1100_s19 + $0x48] sm:$0xff] (!%p765_p12)  ;;  %v615_v60 = vld [vmem:[%s1100_s19 + $0x58] sm:$0xff] (!%p765_p12)  ;;  %v630_v62 = vmax.f32 (!%p765_p12), %v614_v59, 0.0 }
 0x145   : > { %636 = vst [vmem:[%s1100_s19] sm:$0xff] %v620_v43  ;;  %638 = vst [vmem:[%s1100_s19 + $0x10] sm:$0xff] %v622_v45  ;;  %v629_v61 = vmax.f32 %v613_v58, 0.0  ;;  %v631_v63 = vmax.f32 %v615_v60, 0.0 }
 0x146   : > { %637 = vst [vmem:[%s1100_s19 + $0x8] sm:$0xff] %v621_v44  ;;  %639 = vst [vmem:[%s1100_s19 + $0x18] sm:$0xff] %v623_v49 }
 0x147   : > { %644 = vst [vmem:[%s1100_s19 + $0x40] sm:$0xff] %v628_v57  ;;  %645 = vst [vmem:[%s1100_s19 + $0x48] sm:$0xff] %v629_v61 }
 0x148   : > { %v610_v52 = vld [vmem:[%s1100_s19 + $0x30] sm:$0xff]  ;;  %646 = vst [vmem:[%s1100_s19 + $0x50] sm:$0xff] %v630_v62  ;;  %647 = vst [vmem:[%s1100_s19 + $0x58] sm:$0xff] %v631_v63 }
 0x149   : > { %v608_v47 = vld [vmem:[%s1100_s19 + $0x20] sm:$0xff]  ;;  %v626_v55 = vmax.f32 %v610_v52, 0.0  ;;  %v618_v2 = vld [vmem:[%s1100_s19 + $0x70] sm:$0xff] }
 0x14a   : > { %v624_v50 = vmax.f32 %v608_v47, 0.0  ;;  %v611_v53 = vld [vmem:[%s1100_s19 + $0x38] sm:$0xff]  ;;  %v616_v0 = vld [vmem:[%s1100_s19 + $0x60] sm:$0xff]  ;;  %v634_v5 = vmax.f32 %v618_v2, 0.0 }
 0x14b   : > { %v609_v48 = vld [vmem:[%s1100_s19 + $0x28] sm:$0xff]  ;;  %v627_v56 = vmax.f32 %v611_v53, 0.0  ;;  %642 = vst [vmem:[%s1100_s19 + $0x30] sm:$0xff] %v626_v55  ;;  %v632_v3 = vmax.f32 %v616_v0, 0.0  ;;  %v619_v6 = vld [vmem:[%s1100_s19 + $0x78] sm:$0xff] }
 0x14c   : > { %v625_v51 = vmax.f32 %v609_v48, 0.0  ;;  %640 = vst [vmem:[%s1100_s19 + $0x20] sm:$0xff] %v624_v50  ;;  %v617_v1 = vld [vmem:[%s1100_s19 + $0x68] sm:$0xff]  ;;  %v635_v7 = vmax.f32 %v619_v6, 0.0  ;;  %650 = vst [vmem:[%s1100_s19 + $0x70] sm:$0xff] %v634_v5 }
 0x14d   : > { %643 = vst [vmem:[%s1100_s19 + $0x38] sm:$0xff] %v627_v56  ;;  %v633_v4 = vmax.f32 %v617_v1, 0.0  ;;  %648 = vst [vmem:[%s1100_s19 + $0x60] sm:$0xff] %v632_v3 }
 0x14e   : > { %641 = vst [vmem:[%s1100_s19 + $0x28] sm:$0xff] %v625_v51  ;;  %651 = vst [vmem:[%s1100_s19 + $0x78] sm:$0xff] %v635_v7 }
 0x14f   : > { %649 = vst [vmem:[%s1100_s19 + $0x68] sm:$0xff] %v633_v4 }
 0x150 PF: > { %s12_s15 = sadd.s32 1, %s998_s15   ;;  %s1236_s9 = smov %s978_s10 }
 0x151   : > { %p9_p13 = scmp.ge.s32.totalorder %s12_s15, 11   ;;  %s1237_s10 = smov %s1066_s22 }
 0x152   : > { %s1238_s11 = smov %s990_s13  ;;  %s1239_s12 = smov %s994_s14 }
 0x153   : > { %s1240_s13 = smov %s1243_s16  ;;  %s1241_s14 = smov %s1247_s17 }
 0x154   :  { %11 = sbr.rel (!%p9_p13) target bundleno = 4 (0x4), region = 114 }

</bundles_post_ra>
